<compile_context>
chip_gen: v5e
topology: v5e:2x2
jax: 0.10.0
libtpu: 0.0.40
codegen_flags: <defaults>
</compile_context>

<pallas_src>
import jax
import jax.numpy as jnp
from jax.experimental import pallas as pl
from jax.experimental.pallas import tpu as pltpu


def _pseudogen_kernel(x_ref, w_ref, o_ref):
    # x_ref: (P, K)  input
    # w_ref: (F, K)  nn.Linear weight in its native (out_features, in_features)
    #                layout — contraction on axis 1 of both operands gives
    #                x @ W.T without any external transpose.
    # o_ref: (P, F)  sigmoid(x @ W.T)
    acc = jax.lax.dot_general(
        x_ref[...],
        w_ref[...],
        dimension_numbers=(((1,), (1,)), ((), ())),
        preferred_element_type=jnp.float32,
    )
    o_ref[...] = jax.nn.sigmoid(acc).astype(o_ref.dtype)


def pseudogen_forward(x, weight):
    """x: (P, pseudos); weight: (input_length^2, pseudos) (nn.Linear layout).

    Returns sigmoid(x @ weight.T) of shape (P, input_length^2).

    The entire problem fits in VMEM at these sizes, so this is a gridless
    pallas_call: no pipeline machinery, operands land in VMEM once, one MXU
    matmul, one EUP sigmoid, one store.
    """
    P, K = x.shape
    F_out, K2 = weight.shape
    assert K == K2, f"contraction-dim mismatch: x {x.shape} vs weight {weight.shape}"
    return pl.pallas_call(
        _pseudogen_kernel,
        out_shape=jax.ShapeDtypeStruct((P, F_out), x.dtype),
        in_specs=[
            pl.BlockSpec(memory_space=pltpu.MemorySpace.VMEM),
            pl.BlockSpec(memory_space=pltpu.MemorySpace.VMEM),
        ],
        out_specs=pl.BlockSpec(memory_space=pltpu.MemorySpace.VMEM),
    )(x, weight)


if __name__ == "__main__":
    # Small shapes consistent with the module.
    input_length = 16       # output features = input_length**2 = 256
    pseudos = 8

    key = jax.random.PRNGKey(0)
    k_w, _ = jax.random.split(key)

    # Deterministic "Linear" weight init (same shape as nn.Linear(pseudos, L*L)).
    bound = 1.0 / jnp.sqrt(pseudos)
    weight = jax.random.uniform(
        k_w, (input_length * input_length, pseudos),
        minval=-bound, maxval=bound, dtype=jnp.float32)

    # The module's canonical input is its idle_input = eye(pseudos, pseudos).
    x = jnp.eye(pseudos, pseudos, dtype=jnp.float32)

    out = pseudogen_forward(x, weight)
    out = jax.block_until_ready(out)

    # Pure-JAX reference check.
    ref = jax.nn.sigmoid(x @ weight.T)
    assert out.shape == (pseudos, input_length * input_length)
    assert jnp.allclose(out, ref, atol=1e-5, rtol=1e-5), "mismatch vs reference"

    print("KERNEL_OK")
</pallas_src>

<mosaic_0001>
module attributes {stable_mosaic.version = 11 : i64} {
  func.func @_pseudogen_kernel(%arg0: memref<8x8xf32, #tpu.memory_space<vmem>>, %arg1: memref<256x8xf32, #tpu.memory_space<vmem>>, %arg2: memref<8x256xf32, #tpu.memory_space<vmem>>) attributes {dimension_semantics = [], scalar_prefetch = 0 : i64, scratch_operands = 0 : i64, tpu.core_type = #tpu.core_type<tc>} {
    %c0 = arith.constant 0 : index
    %c0_0 = arith.constant 0 : index
    %0 = vector.load %arg0[%c0, %c0_0] : memref<8x8xf32, #tpu.memory_space<vmem>>, vector<8x8xf32>
    %c0_1 = arith.constant 0 : index
    %c0_2 = arith.constant 0 : index
    %1 = vector.load %arg1[%c0_1, %c0_2] : memref<256x8xf32, #tpu.memory_space<vmem>>, vector<256x8xf32>
    %cst = arith.constant dense<0.000000e+00> : vector<8x256xf32>
    %2 = tpu.matmul %0, %1, %cst {dimension_numbers = #tpu.dot_dimension_numbers<[1], [1], [0], [0], [0, 0, 1, 0], [], []>} : vector<8x8xf32>, vector<256x8xf32>, vector<8x256xf32> -> vector<8x256xf32>
    %3 = arith.negf %2 : vector<8x256xf32>
    %4 = math.exp %3 : vector<8x256xf32>
    %cst_3 = arith.constant 1.000000e+00 : f32
    %5 = vector.broadcast %cst_3 : f32 to vector<8x256xf32>
    %6 = arith.addf %5, %4 : vector<8x256xf32>
    %7 = arith.divf %5, %6 : vector<8x256xf32>
    %c0_4 = arith.constant 0 : index
    %c0_5 = arith.constant 0 : index
    %8 = vector.load %arg2[%c0_4, %c0_5] : memref<8x256xf32, #tpu.memory_space<vmem>>, vector<8x256xf32>
    tpu.vector_store %arg2[%c0_4, %c0_5], %7 {strides = array<i32>} : memref<8x256xf32, #tpu.memory_space<vmem>>, vector<8x256xf32>,
    return
  }
}

</mosaic_0001>

<bundles_post_ra>
// kernel: tpu_custom_call.1
= control target key start
LH: loop header
LB: loop body
LE: loop exit
PB: predicated region body
PF: predicated region fallthrough
CT: control target
= control target key end

     0   :  { %vm45_vm0 = vcmask 64512   ;;  %s464_s0 = inlined_call_operand.vmem [shape: f32[8,8], index: 0, kind: input, shape index: {}]   ;;  %s465_s1 = inlined_call_operand.vmem [shape: f32[256,8], index: 1, kind: input, shape index: {}]   ;;  %s466_s2 = inlined_call_operand.hbm [shape: f32[8,256], index: 2, kind: output, shape index: {}]  }
   0x1   :  { %v28_v0 = vld [vmem:[%s465_s1 + $0x78] sm:$0xff]  ;;  %v27_v2 = vld [vmem:[%s465_s1 + $0x70] sm:$0xff]  ;;  %v26_v4 = vld [vmem:[%s465_s1 + $0x68] sm:$0xff] }
   0x2   :  { %v44_v1 = vld [vmem:[%s465_s1 + $0xf8] sm:$0xff]  ;;  %241 = vmatpush.xpose.msk.msra.mxu0 %vm45_vm0, %v28_v0  ;;  %v43_v3 = vld [vmem:[%s465_s1 + $0xf0] sm:$0xff]  ;;  %v42_v5 = vld [vmem:[%s465_s1 + $0xe8] sm:$0xff] }
   0x3   :  { %258 = vmatpush.xpose.msk.msra.mxu1 %vm45_vm0, %v44_v1 }
   0x6   :  { %242 = vmatpush.xpose.msk.msra.mxu0 %vm45_vm0, %v27_v2 }
   0x7   :  { %259 = vmatpush.xpose.msk.msra.mxu1 %vm45_vm0, %v43_v3 }
   0x8   :  { %7 = vsyncpa [#allocation3], 0  ;;  %v25_v6 = vld [vmem:[%s465_s1 + $0x60] sm:$0xff]  ;;  %v24_v8 = vld [vmem:[%s465_s1 + $0x58] sm:$0xff]  ;;  %s232_s21 = sshll.u32 %s466_s2, 4  ;;  %s233_s21 = int_to_ptr.hbm [resolvable:$true] %s232_s21 }
   0x9   :  { %v41_v7 = vld [vmem:[%s465_s1 + $0xe0] sm:$0xff]  ;;  %v40_v9 = vld [vmem:[%s465_s1 + $0xd8] sm:$0xff]  ;;  %v23_v10 = vld [vmem:[%s465_s1 + $0x50] sm:$0xff] }
   0xa   :  { %243 = vmatpush.xpose.msk.msra.mxu0 %vm45_vm0, %v26_v4  ;;  %v39_v11 = vld [vmem:[%s465_s1 + $0xd0] sm:$0xff]  ;;  %v22_v12 = vld [vmem:[%s465_s1 + $0x48] sm:$0xff]  ;;  %v21_v14 = vld [vmem:[%s465_s1 + $0x40] sm:$0xff] }
   0xb   :  { %260 = vmatpush.xpose.msk.msra.mxu1 %vm45_vm0, %v42_v5  ;;  %v38_v13 = vld [vmem:[%s465_s1 + $0xc8] sm:$0xff]  ;;  %v37_v15 = vld [vmem:[%s465_s1 + $0xc0] sm:$0xff]  ;;  %v20_v16 = vld [vmem:[%s465_s1 + $0x38] sm:$0xff] }
   0xc   :  { %v36_v17 = vld [vmem:[%s465_s1 + $0xb8] sm:$0xff]  ;;  %v19_v18 = vld [vmem:[%s465_s1 + $0x30] sm:$0xff]  ;;  %v18_v20 = vld [vmem:[%s465_s1 + $0x28] sm:$0xff] }
   0xd   :  { %v35_v19 = vld [vmem:[%s465_s1 + $0xb0] sm:$0xff]  ;;  %v34_v21 = vld [vmem:[%s465_s1 + $0xa8] sm:$0xff]  ;;  %v17_v22 = vld [vmem:[%s465_s1 + $0x20] sm:$0xff] }
   0xe   :  { %244 = vmatpush.xpose.msk.msra.mxu0 %vm45_vm0, %v25_v6  ;;  %v33_v23 = vld [vmem:[%s465_s1 + $0xa0] sm:$0xff]  ;;  %v16_v24 = vld [vmem:[%s465_s1 + $0x18] sm:$0xff]  ;;  %v15_v26 = vld [vmem:[%s465_s1 + $0x10] sm:$0xff] }
   0xf   :  { %261 = vmatpush.xpose.msk.msra.mxu1 %vm45_vm0, %v41_v7  ;;  %v32_v25 = vld [vmem:[%s465_s1 + $0x98] sm:$0xff]  ;;  %v31_v27 = vld [vmem:[%s465_s1 + $0x90] sm:$0xff]  ;;  %v14_v28 = vld [vmem:[%s465_s1 + $0x8] sm:$0xff] }
  0x10   :  { %v30_v29 = vld [vmem:[%s465_s1 + $0x88] sm:$0xff]  ;;  %v13_v30 = vld [vmem:[%s465_s1] sm:$0xff] }
  0x11   :  { %v29_v31 = vld [vmem:[%s465_s1 + $0x80] sm:$0xff] }
  0x12   :  { %245 = vmatpush.xpose.msk.msra.mxu0 %vm45_vm0, %v24_v8  ;;  %v12_v32 = vld [vmem:[%s464_s0] sm:$0xff]  ;;  %s312_s0 = smov [#allocation2]  }
  0x13   :  { %262 = vmatpush.xpose.msk.msra.mxu1 %vm45_vm0, %v40_v9  ;;  %s230_s1 = sshll.u32 %s312_s0, 4  ;;  %s231_s1 = int_to_ptr.vmem [resolvable:$true] %s230_s1 }
  0x16   :  { %246 = vmatpush.xpose.msk.msra.mxu0 %vm45_vm0, %v23_v10 }
  0x17   :  { %263 = vmatpush.xpose.msk.msra.mxu1 %vm45_vm0, %v39_v11 }
  0x1a   :  { %247 = vmatpush.xpose.msk.msra.mxu0 %vm45_vm0, %v22_v12 }
  0x1b   :  { %264 = vmatpush.xpose.msk.msra.mxu1 %vm45_vm0, %v38_v13 }
  0x1e   :  { %248 = vmatpush.xpose.msk.msra.mxu0 %vm45_vm0, %v21_v14 }
  0x1f   :  { %265 = vmatpush.xpose.msk.msra.mxu1 %vm45_vm0, %v37_v15 }
  0x22   :  { %249 = vmatpush.xpose.msk.msra.mxu0 %vm45_vm0, %v20_v16 }
  0x23   :  { %266 = vmatpush.xpose.msk.msra.mxu1 %vm45_vm0, %v36_v17 }
  0x26   :  { %250 = vmatpush.xpose.msk.msra.mxu0 %vm45_vm0, %v19_v18 }
  0x27   :  { %267 = vmatpush.xpose.msk.msra.mxu1 %vm45_vm0, %v35_v19 }
  0x2a   :  { %251 = vmatpush.xpose.msk.msra.mxu0 %vm45_vm0, %v18_v20 }
  0x2b   :  { %268 = vmatpush.xpose.msk.msra.mxu1 %vm45_vm0, %v34_v21 }
  0x2e   :  { %252 = vmatpush.xpose.msk.msra.mxu0 %vm45_vm0, %v17_v22 }
  0x2f   :  { %269 = vmatpush.xpose.msk.msra.mxu1 %vm45_vm0, %v33_v23 }
  0x32   :  { %253 = vmatpush.xpose.msk.msra.mxu0 %vm45_vm0, %v16_v24 }
  0x33   :  { %270 = vmatpush.xpose.msk.msra.mxu1 %vm45_vm0, %v32_v25 }
  0x36   :  { %254 = vmatpush.xpose.msk.msra.mxu0 %vm45_vm0, %v15_v26 }
  0x37   :  { %271 = vmatpush.xpose.msk.msra.mxu1 %vm45_vm0, %v31_v27 }
  0x3a   :  { %255 = vmatpush.xpose.msk.msra.mxu0 %vm45_vm0, %v14_v28 }
  0x3b   :  { %272 = vmatpush.xpose.msk.msra.mxu1 %vm45_vm0, %v30_v29 }
  0x3e   :  { %256 = vmatpush.xpose.msk.msra.mxu0 %vm45_vm0, %v13_v30 }
  0x3f   :  { %273 = vmatpush.xpose.msk.msra.mxu1 %vm45_vm0, %v29_v31 }
  0x41   :  { %257 = vmatmul.msk.f32.vlgmr.msra.gmra.mxu0 %vm45_vm0, %v12_v32 }
  0x42   :  { %274 = vmatmul.msk.f32.vlgmr.msra.gmra.mxu1 %vm45_vm0, %v12_v32 }
  0xbe   :  { %v162_v33 = vpop.f32.mrf.mxu0 }
  0xbf   :  { %v182_v34 = vpop.f32.mrf.mxu1  ;;  %v275_v35 = vmul.f32 -1.442695, %v162_v33 }
  0xc0   :  { %v276_v36 = vmul.f32 -1.442695, %v182_v34 }
  0xc1   :  { %278 = vpow2.f32 %v275_v35 }
  0xc2   :  { %280 = vpow2.f32 %v276_v36 }
  0xc7   :  { %v279_v37 = vpop.eup %278 }
  0xc8   :  { %v281_v38 = vpop.eup %280  ;;  %v191_v39 = vadd.f32 1.0, %v279_v37 }
  0xc9   :  { %v192_v40 = vadd.f32 1.0, %v281_v38 }
  0xca   :  { %282 = vrcp.f32 %v191_v39  ;;  %v204_v47 = vand.u32 2147483648, %v191_v39  ;;  %v202_v49 = vand.u32 2147483647, %v191_v39  ;;  %vm198_vm3 = vweird.f32 %v191_v39 }
  0xcb   :  { %284 = vrcp.f32 %v192_v40  ;;  %v219_v50 = vand.u32 2147483648, %v192_v40  ;;  %v217_v52 = vand.u32 2147483647, %v192_v40  ;;  %vm213_vm5 = vweird.f32 %v192_v40 }
  0xcc   :  { %v205_v54 = vor.u32 1.1754944e-38, %v204_v47  ;;  %vm203_vm6 = vcmp.eq.f32.partialorder %v202_v49, 8.507059e+37 }
  0xcd   :  { %v220_v57 = vor.u32 1.1754944e-38, %v219_v50  ;;  %vm218_vm8 = vcmp.eq.f32.partialorder %v217_v52, 8.507059e+37 }
  0xd0   :  { %v283_v41 = vpop.eup %282 }
  0xd1   :  { %v285_v42 = vpop.eup %284  ;;  %v194_v43 = vmul.f32 %v283_v41, %v191_v39  ;;  %vm199_vm1 = vweird.f32 %v283_v41 }
  0xd2   :  { %v209_v44 = vmul.f32 %v285_v42, %v192_v40  ;;  %vm214_vm2 = vweird.f32 %v285_v42  ;;  %vm200_vm4 = vmor %vm198_vm3, %vm199_vm1 }
  0xd3   :  { %v195_v45 = vsub.f32 1.0, %v194_v43  ;;  %vm215_vm7 = vmor %vm213_vm5, %vm214_vm2 }
  0xd4   :  { %v210_v46 = vsub.f32 1.0, %v209_v44 }
  0xd5   :  { %v196_v48 = vmul.f32 %v283_v41, %v195_v45 }
  0xd6   :  { %v211_v51 = vmul.f32 %v285_v42, %v210_v46 }
  0xd7   :  { %v197_v53 = vadd.f32 %v283_v41, %v196_v48 }
  0xd8   :  { %v212_v55 = vadd.f32 %v285_v42, %v211_v51 }
  0xd9   :  { %v201_v56 = vsel %vm200_vm4, %v283_v41, %v197_v53 }
  0xda   :  { %v206_v58 = vsel %vm203_vm6, %v205_v54, %v201_v56  ;;  %v216_v59 = vsel %vm215_vm7, %v285_v42, %v212_v55 }
  0xdb   :  { %v221_v60 = vsel %vm218_vm8, %v220_v57, %v216_v59  ;;  %223 = vst [vmem:[#allocation2] sm:$0xff] %v206_v58 }
  0xdc   :  { %224 = vst [vmem:[#allocation2 + $0x8] sm:$0xff] %v221_v60 }
  0xdd   :  { %235 = dma.vmem_to_hbm [thread:$0]  %s231_s1, 256, %s233_s21, [#allocation3]  }
  0xde   :  { %310 = dma.done.wait [#allocation3], 256  }
  0xdf   :  { %311 = vsyncadd [#allocation3], 4294967040 }
  0xe0   :  { %240 = vsyncpa [#allocation3], 1 }

</bundles_post_ra>
